<compile_context>
chip_gen: v7x
topology: tpu7x:2x2x1
jax: 0.10.0
libtpu: 0.0.40
codegen_flags: <defaults>
</compile_context>

<pallas_src>
import jax
import jax.numpy as jnp
import numpy as np
from jax.experimental import pallas as pl
from jax.experimental.pallas import tpu as pltpu


def gru_decoder_kernel(x_ref, mask_ref, h0_ref, wih_ref, whh_ref,
                       bgi_ref, bhn_ref, wlin_ref, blin_ref,
                       o_ref, gi_ref, hs_ref):
    Bp, D = h0_ref.shape
    T = hs_ref.shape[0] // Bp

    # ---- Prologue: hoisted input-to-hidden matmul for ALL time steps. ----
    gi_ref[...] = (jnp.dot(x_ref[...], wih_ref[...],
                           preferred_element_type=jnp.float32) + bgi_ref[...])

    whh = whh_ref[...]
    b_hn = bhn_ref[...]                              # (1, D)

    # ---- Recurrence: fully unrolled; only h @ W_hh is on the h-chain. ----
    def step(t, h):
        row = pl.multiple_of(t * Bp, Bp)
        gi = gi_ref[pl.ds(row, Bp), :]               # (Bp, 3D), gates [r|z|n]
        gh = jnp.dot(h, whh, preferred_element_type=jnp.float32)
        r = jax.nn.sigmoid(gi[:, :D] + gh[:, :D])
        z = jax.nn.sigmoid(gi[:, D:2 * D] + gh[:, D:2 * D])
        n = jnp.tanh(gi[:, 2 * D:] + r * (gh[:, 2 * D:] + b_hn))
        h_new = n + z * (h - n)                      # == (1 - z) * n + z * h
        hs_ref[pl.ds(row, Bp), :] = h_new
        return h_new

    jax.lax.fori_loop(0, T, step, h0_ref[...], unroll=True)

    # ---- Epilogue: mask pads (-> zeros -> Linear bias) + one batched,
    # lane-dense output projection and store. ----
    hs = hs_ref[...] * mask_ref[...]
    o_ref[...] = (jnp.dot(hs, wlin_ref[...],
                          preferred_element_type=jnp.float32) + blin_ref[...])


def _round_up(x, m):
    return ((x + m - 1) // m) * m


def decoder_forward(words, lengths, pre_h, params, max_len=None):
    """PyTorch-facing wrapper: words (B,T) int32, lengths (B,), pre_h (B,D)."""
    emb_tbl = params["embedding"]
    B, T = words.shape
    D = emb_tbl.shape[1]
    V = params["lin_w"].shape[1]
    Bp = _round_up(B, 8)        # full sublane group
    Vp = _round_up(V, 128)      # full lane group -> unmasked stores

    # Pad the batch; padded rows get length 0 -> masked to zero before the
    # Linear and sliced away afterwards.
    words_p = jnp.zeros((Bp, T), jnp.int32).at[:B, :].set(words.astype(jnp.int32))
    lens_p = jnp.zeros((Bp,), jnp.int32).at[:B].set(lengths.astype(jnp.int32))
    h0_p = jnp.zeros((Bp, D), jnp.float32).at[:B, :].set(pre_h.astype(jnp.float32))

    # Embedding gather directly in time-major order: (T, Bp, D) -> (T*Bp, D).
    # TODO(synk): could be fused into the kernel (SMEM-prefetched token ids +
    # per-row DMA from an HBM embedding ref) if the XLA gather ever matters.
    x2d = emb_tbl[words_p.T].astype(jnp.float32).reshape(T * Bp, D)

    # Validity mask precomputed once (keeps the recurrence chain math-only).
    valid = jnp.arange(T, dtype=jnp.int32)[:, None] < lens_p[None, :]   # (T, Bp)
    mask2d = valid.astype(jnp.float32).reshape(T * Bp, 1)

    # Pre-fold biases: r/z gates take (b_ih + b_hh) once inside gi; only b_hn
    # must stay inside the n gate's  r * (h @ W_hn + b_hn)  term.
    b_gi = params["b_ih"] + jnp.concatenate(
        [params["b_hh"][:, :2 * D], jnp.zeros((1, D), jnp.float32)], axis=1)
    b_hn = params["b_hh"][:, 2 * D:]

    # Pad the output projection to a full 128-lane width.
    lin_w_p = jnp.zeros((D, Vp), jnp.float32).at[:, :V].set(params["lin_w"])
    lin_b_p = jnp.zeros((1, Vp), jnp.float32).at[:, :V].set(params["lin_b"])

    out2d = pl.pallas_call(
        gru_decoder_kernel,
        out_shape=jax.ShapeDtypeStruct((T * Bp, Vp), jnp.float32),
        in_specs=[pl.BlockSpec(memory_space=pltpu.MemorySpace.VMEM)] * 9,
        out_specs=pl.BlockSpec(memory_space=pltpu.MemorySpace.VMEM),
        scratch_shapes=[
            pltpu.VMEM((T * Bp, 3 * D), jnp.float32),   # hoisted gi
            pltpu.VMEM((T * Bp, D), jnp.float32),       # per-step hidden states
        ],
    )(x2d, mask2d, h0_p, params["w_ih_t"], params["w_hh_t"],
      b_gi, b_hn, lin_w_p, lin_b_p)

    out = out2d.reshape(T, Bp, Vp).transpose(1, 0, 2)   # (Bp, T, Vp)

    if max_len is None:
        # pad_packed_sequence emits max(lengths) steps.  Computed host-side
        # (pass max_len explicitly when calling under jax.jit to avoid a
        # concretization error / device sync).
        max_len = int(np.max(np.asarray(lengths)))
    return out[:B, :max_len, :V]


def reference_forward(words, lengths, pre_h, params):
    """Pure-JAX reference with identical semantics (for verification)."""
    emb = params["embedding"][words]
    B, T, D = emb.shape
    h = pre_h
    outs = []
    for t in range(T):
        xt = emb[:, t, :]
        gi = xt @ params["w_ih_t"] + params["b_ih"]
        gh = h @ params["w_hh_t"] + params["b_hh"]
        i_r, i_z, i_n = gi[:, :D], gi[:, D:2 * D], gi[:, 2 * D:]
        h_r, h_z, h_n = gh[:, :D], gh[:, D:2 * D], gh[:, 2 * D:]
        r = jax.nn.sigmoid(i_r + h_r)
        z = jax.nn.sigmoid(i_z + h_z)
        n = jnp.tanh(i_n + r * h_n)
        h_new = (1.0 - z) * n + z * h
        valid = (t < lengths)[:, None]
        h = jnp.where(valid, h_new, h)
        out_h = jnp.where(valid, h_new, 0.0)
        outs.append(out_h @ params["lin_w"] + params["lin_b"])
    out = jnp.stack(outs, axis=1)
    return out[:, :int(np.max(np.asarray(lengths))), :]


if __name__ == "__main__":
    # Module config: args.dim=16, args.bidir=True -> self.dim = 32, rnn='gru'
    dict_size = 64
    dim_arg, bidir = 16, True
    D = dim_arg * (2 if bidir else 1)   # 32
    B, T = 4, 8

    key = jax.random.PRNGKey(0)
    ks = jax.random.split(key, 9)
    scale = 1.0 / np.sqrt(D)
    params = {
        "embedding": jax.random.normal(ks[0], (dict_size, D), jnp.float32) * 0.1,
        "w_ih_t": jax.random.uniform(ks[1], (D, 3 * D), jnp.float32, -scale, scale),
        "w_hh_t": jax.random.uniform(ks[2], (D, 3 * D), jnp.float32, -scale, scale),
        "b_ih": jax.random.uniform(ks[3], (1, 3 * D), jnp.float32, -scale, scale),
        "b_hh": jax.random.uniform(ks[4], (1, 3 * D), jnp.float32, -scale, scale),
        "lin_w": jax.random.uniform(ks[5], (D, dict_size), jnp.float32, -scale, scale),
        "lin_b": jax.random.uniform(ks[6], (1, dict_size), jnp.float32, -scale, scale),
    }

    words = jax.random.randint(ks[7], (B, T), 0, dict_size, dtype=jnp.int32)
    lengths = jnp.array([8, 5, 3, 8], dtype=jnp.int32)      # max == T
    pre_h = jax.random.normal(ks[8], (B, D), jnp.float32)   # encoder hidden

    out = decoder_forward(words, lengths, pre_h, params)
    out = jax.block_until_ready(out)

    ref = reference_forward(words, lengths, pre_h, params)
    np.testing.assert_allclose(np.asarray(out), np.asarray(ref),
                               rtol=1e-5, atol=1e-5)
    assert out.shape == (B, int(np.max(np.asarray(lengths))), dict_size)

    print("KERNEL_OK")
</pallas_src>

<mosaic_0001>
module attributes {stable_mosaic.version = 11 : i64} {
  func.func @gru_decoder_kernel(%arg0: memref<64x32xf32, #tpu.memory_space<vmem>>, %arg1: memref<64x1xf32, #tpu.memory_space<vmem>>, %arg2: memref<8x32xf32, #tpu.memory_space<vmem>>, %arg3: memref<32x96xf32, #tpu.memory_space<vmem>>, %arg4: memref<32x96xf32, #tpu.memory_space<vmem>>, %arg5: memref<1x96xf32, #tpu.memory_space<vmem>>, %arg6: memref<1x32xf32, #tpu.memory_space<vmem>>, %arg7: memref<32x128xf32, #tpu.memory_space<vmem>>, %arg8: memref<1x128xf32, #tpu.memory_space<vmem>>, %arg9: memref<64x128xf32, #tpu.memory_space<vmem>>, %arg10: memref<64x96xf32, #tpu.memory_space<vmem>>, %arg11: memref<64x32xf32, #tpu.memory_space<vmem>>) attributes {dimension_semantics = [], scalar_prefetch = 0 : i64, scratch_operands = 2 : i64, tpu.core_type = #tpu.core_type<tc>} {
    %c0 = arith.constant 0 : index
    %c0_0 = arith.constant 0 : index
    %0 = vector.load %arg0[%c0, %c0_0] : memref<64x32xf32, #tpu.memory_space<vmem>>, vector<64x32xf32>
    %c0_1 = arith.constant 0 : index
    %c0_2 = arith.constant 0 : index
    %1 = vector.load %arg3[%c0_1, %c0_2] : memref<32x96xf32, #tpu.memory_space<vmem>>, vector<32x96xf32>
    %cst = arith.constant dense<0.000000e+00> : vector<64x96xf32>
    %2 = tpu.matmul %0, %1, %cst {dimension_numbers = #tpu.dot_dimension_numbers<[1], [0], [0], [1], [0, 0, 1, 1], [], []>} : vector<64x32xf32>, vector<32x96xf32>, vector<64x96xf32> -> vector<64x96xf32>
    %c0_3 = arith.constant 0 : index
    %c0_4 = arith.constant 0 : index
    %3 = vector.load %arg5[%c0_3, %c0_4] : memref<1x96xf32, #tpu.memory_space<vmem>>, vector<1x96xf32>
    %4 = vector.broadcast %3 : vector<1x96xf32> to vector<64x96xf32>
    %5 = arith.addf %2, %4 : vector<64x96xf32>
    %c0_5 = arith.constant 0 : index
    %c0_6 = arith.constant 0 : index
    %6 = vector.load %arg10[%c0_5, %c0_6] : memref<64x96xf32, #tpu.memory_space<vmem>>, vector<64x96xf32>
    tpu.vector_store %arg10[%c0_5, %c0_6], %5 {strides = array<i32>} : memref<64x96xf32, #tpu.memory_space<vmem>>, vector<64x96xf32>,
    %c0_7 = arith.constant 0 : index
    %c0_8 = arith.constant 0 : index
    %7 = vector.load %arg4[%c0_7, %c0_8] : memref<32x96xf32, #tpu.memory_space<vmem>>, vector<32x96xf32>
    %c0_9 = arith.constant 0 : index
    %c0_10 = arith.constant 0 : index
    %8 = vector.load %arg6[%c0_9, %c0_10] : memref<1x32xf32, #tpu.memory_space<vmem>>, vector<1x32xf32>
    %c0_11 = arith.constant 0 : index
    %c0_12 = arith.constant 0 : index
    %9 = vector.load %arg2[%c0_11, %c0_12] : memref<8x32xf32, #tpu.memory_space<vmem>>, vector<8x32xf32>
    %c0_i32 = arith.constant 0 : i32
    %c8_i32 = arith.constant 8 : i32
    %10 = arith.muli %c0_i32, %c8_i32 : i32
    %11 = tpu.assume_multiple %10, 8 : i32
    %12 = arith.index_cast %11 : i32 to index
    %c0_13 = arith.constant 0 : index
    %13 = vector.load %arg10[%12, %c0_13] : memref<64x96xf32, #tpu.memory_space<vmem>>, vector<8x96xf32>
    %cst_14 = arith.constant dense<0.000000e+00> : vector<8x96xf32>
    %14 = tpu.matmul %9, %7, %cst_14 {dimension_numbers = #tpu.dot_dimension_numbers<[1], [0], [0], [1], [0, 0, 1, 1], [], []>} : vector<8x32xf32>, vector<32x96xf32>, vector<8x96xf32> -> vector<8x96xf32>
    %15 = vector.extract_strided_slice %13 {offsets = [0, 0], sizes = [8, 32], strides = [1, 1]} : vector<8x96xf32> to vector<8x32xf32>
    %16 = vector.extract_strided_slice %14 {offsets = [0, 0], sizes = [8, 32], strides = [1, 1]} : vector<8x96xf32> to vector<8x32xf32>
    %17 = arith.addf %15, %16 : vector<8x32xf32>
    %18 = arith.negf %17 : vector<8x32xf32>
    %19 = math.exp %18 : vector<8x32xf32>
    %cst_15 = arith.constant 1.000000e+00 : f32
    %20 = vector.broadcast %cst_15 : f32 to vector<8x32xf32>
    %21 = arith.addf %20, %19 : vector<8x32xf32>
    %22 = arith.divf %20, %21 : vector<8x32xf32>
    %23 = vector.extract_strided_slice %13 {offsets = [0, 32], sizes = [8, 32], strides = [1, 1]} : vector<8x96xf32> to vector<8x32xf32>
    %24 = vector.extract_strided_slice %14 {offsets = [0, 32], sizes = [8, 32], strides = [1, 1]} : vector<8x96xf32> to vector<8x32xf32>
    %25 = arith.addf %23, %24 : vector<8x32xf32>
    %26 = arith.negf %25 : vector<8x32xf32>
    %27 = math.exp %26 : vector<8x32xf32>
    %cst_16 = arith.constant 1.000000e+00 : f32
    %28 = vector.broadcast %cst_16 : f32 to vector<8x32xf32>
    %29 = arith.addf %28, %27 : vector<8x32xf32>
    %30 = arith.divf %28, %29 : vector<8x32xf32>
    %31 = vector.extract_strided_slice %13 {offsets = [0, 64], sizes = [8, 32], strides = [1, 1]} : vector<8x96xf32> to vector<8x32xf32>
    %32 = vector.extract_strided_slice %14 {offsets = [0, 64], sizes = [8, 32], strides = [1, 1]} : vector<8x96xf32> to vector<8x32xf32>
    %33 = vector.broadcast %8 : vector<1x32xf32> to vector<8x32xf32>
    %34 = arith.addf %32, %33 : vector<8x32xf32>
    %35 = arith.mulf %22, %34 : vector<8x32xf32>
    %36 = arith.addf %31, %35 : vector<8x32xf32>
    %37 = math.tanh %36 : vector<8x32xf32>
    %38 = arith.subf %9, %37 : vector<8x32xf32>
    %39 = arith.mulf %30, %38 : vector<8x32xf32>
    %40 = arith.addf %37, %39 : vector<8x32xf32>
    %41 = arith.index_cast %11 : i32 to index
    %c0_17 = arith.constant 0 : index
    %42 = vector.load %arg11[%41, %c0_17] : memref<64x32xf32, #tpu.memory_space<vmem>>, vector<8x32xf32>
    tpu.vector_store %arg11[%41, %c0_17], %40 {strides = array<i32>} : memref<64x32xf32, #tpu.memory_space<vmem>>, vector<8x32xf32>,
    %c1_i32 = arith.constant 1 : i32
    %c8_i32_18 = arith.constant 8 : i32
    %43 = arith.muli %c1_i32, %c8_i32_18 : i32
    %44 = tpu.assume_multiple %43, 8 : i32
    %45 = arith.index_cast %44 : i32 to index
    %c0_19 = arith.constant 0 : index
    %46 = vector.load %arg10[%45, %c0_19] : memref<64x96xf32, #tpu.memory_space<vmem>>, vector<8x96xf32>
    %cst_20 = arith.constant dense<0.000000e+00> : vector<8x96xf32>
    %47 = tpu.matmul %40, %7, %cst_20 {dimension_numbers = #tpu.dot_dimension_numbers<[1], [0], [0], [1], [0, 0, 1, 1], [], []>} : vector<8x32xf32>, vector<32x96xf32>, vector<8x96xf32> -> vector<8x96xf32>
    %48 = vector.extract_strided_slice %46 {offsets = [0, 0], sizes = [8, 32], strides = [1, 1]} : vector<8x96xf32> to vector<8x32xf32>
    %49 = vector.extract_strided_slice %47 {offsets = [0, 0], sizes = [8, 32], strides = [1, 1]} : vector<8x96xf32> to vector<8x32xf32>
    %50 = arith.addf %48, %49 : vector<8x32xf32>
    %51 = arith.negf %50 : vector<8x32xf32>
    %52 = math.exp %51 : vector<8x32xf32>
    %cst_21 = arith.constant 1.000000e+00 : f32
    %53 = vector.broadcast %cst_21 : f32 to vector<8x32xf32>
    %54 = arith.addf %53, %52 : vector<8x32xf32>
    %55 = arith.divf %53, %54 : vector<8x32xf32>
    %56 = vector.extract_strided_slice %46 {offsets = [0, 32], sizes = [8, 32], strides = [1, 1]} : vector<8x96xf32> to vector<8x32xf32>
    %57 = vector.extract_strided_slice %47 {offsets = [0, 32], sizes = [8, 32], strides = [1, 1]} : vector<8x96xf32> to vector<8x32xf32>
    %58 = arith.addf %56, %57 : vector<8x32xf32>
    %59 = arith.negf %58 : vector<8x32xf32>
    %60 = math.exp %59 : vector<8x32xf32>
    %cst_22 = arith.constant 1.000000e+00 : f32
    %61 = vector.broadcast %cst_22 : f32 to vector<8x32xf32>
    %62 = arith.addf %61, %60 : vector<8x32xf32>
    %63 = arith.divf %61, %62 : vector<8x32xf32>
    %64 = vector.extract_strided_slice %46 {offsets = [0, 64], sizes = [8, 32], strides = [1, 1]} : vector<8x96xf32> to vector<8x32xf32>
    %65 = vector.extract_strided_slice %47 {offsets = [0, 64], sizes = [8, 32], strides = [1, 1]} : vector<8x96xf32> to vector<8x32xf32>
    %66 = vector.broadcast %8 : vector<1x32xf32> to vector<8x32xf32>
    %67 = arith.addf %65, %66 : vector<8x32xf32>
    %68 = arith.mulf %55, %67 : vector<8x32xf32>
    %69 = arith.addf %64, %68 : vector<8x32xf32>
    %70 = math.tanh %69 : vector<8x32xf32>
    %71 = arith.subf %40, %70 : vector<8x32xf32>
    %72 = arith.mulf %63, %71 : vector<8x32xf32>
    %73 = arith.addf %70, %72 : vector<8x32xf32>
    %74 = arith.index_cast %44 : i32 to index
    %c0_23 = arith.constant 0 : index
    %75 = vector.load %arg11[%74, %c0_23] : memref<64x32xf32, #tpu.memory_space<vmem>>, vector<8x32xf32>
    tpu.vector_store %arg11[%74, %c0_23], %73 {strides = array<i32>} : memref<64x32xf32, #tpu.memory_space<vmem>>, vector<8x32xf32>,
    %c2_i32 = arith.constant 2 : i32
    %c8_i32_24 = arith.constant 8 : i32
    %76 = arith.muli %c2_i32, %c8_i32_24 : i32
    %77 = tpu.assume_multiple %76, 8 : i32
    %78 = arith.index_cast %77 : i32 to index
    %c0_25 = arith.constant 0 : index
    %79 = vector.load %arg10[%78, %c0_25] : memref<64x96xf32, #tpu.memory_space<vmem>>, vector<8x96xf32>
    %cst_26 = arith.constant dense<0.000000e+00> : vector<8x96xf32>
    %80 = tpu.matmul %73, %7, %cst_26 {dimension_numbers = #tpu.dot_dimension_numbers<[1], [0], [0], [1], [0, 0, 1, 1], [], []>} : vector<8x32xf32>, vector<32x96xf32>, vector<8x96xf32> -> vector<8x96xf32>
    %81 = vector.extract_strided_slice %79 {offsets = [0, 0], sizes = [8, 32], strides = [1, 1]} : vector<8x96xf32> to vector<8x32xf32>
    %82 = vector.extract_strided_slice %80 {offsets = [0, 0], sizes = [8, 32], strides = [1, 1]} : vector<8x96xf32> to vector<8x32xf32>
    %83 = arith.addf %81, %82 : vector<8x32xf32>
    %84 = arith.negf %83 : vector<8x32xf32>
    %85 = math.exp %84 : vector<8x32xf32>
    %cst_27 = arith.constant 1.000000e+00 : f32
    %86 = vector.broadcast %cst_27 : f32 to vector<8x32xf32>
    %87 = arith.addf %86, %85 : vector<8x32xf32>
    %88 = arith.divf %86, %87 : vector<8x32xf32>
    %89 = vector.extract_strided_slice %79 {offsets = [0, 32], sizes = [8, 32], strides = [1, 1]} : vector<8x96xf32> to vector<8x32xf32>
    %90 = vector.extract_strided_slice %80 {offsets = [0, 32], sizes = [8, 32], strides = [1, 1]} : vector<8x96xf32> to vector<8x32xf32>
    %91 = arith.addf %89, %90 : vector<8x32xf32>
    %92 = arith.negf %91 : vector<8x32xf32>
    %93 = math.exp %92 : vector<8x32xf32>
    %cst_28 = arith.constant 1.000000e+00 : f32
    %94 = vector.broadcast %cst_28 : f32 to vector<8x32xf32>
    %95 = arith.addf %94, %93 : vector<8x32xf32>
    %96 = arith.divf %94, %95 : vector<8x32xf32>
    %97 = vector.extract_strided_slice %79 {offsets = [0, 64], sizes = [8, 32], strides = [1, 1]} : vector<8x96xf32> to vector<8x32xf32>
    %98 = vector.extract_strided_slice %80 {offsets = [0, 64], sizes = [8, 32], strides = [1, 1]} : vector<8x96xf32> to vector<8x32xf32>
    %99 = vector.broadcast %8 : vector<1x32xf32> to vector<8x32xf32>
    %100 = arith.addf %98, %99 : vector<8x32xf32>
    %101 = arith.mulf %88, %100 : vector<8x32xf32>
    %102 = arith.addf %97, %101 : vector<8x32xf32>
    %103 = math.tanh %102 : vector<8x32xf32>
    %104 = arith.subf %73, %103 : vector<8x32xf32>
    %105 = arith.mulf %96, %104 : vector<8x32xf32>
    %106 = arith.addf %103, %105 : vector<8x32xf32>
    %107 = arith.index_cast %77 : i32 to index
    %c0_29 = arith.constant 0 : index
    %108 = vector.load %arg11[%107, %c0_29] : memref<64x32xf32, #tpu.memory_space<vmem>>, vector<8x32xf32>
    tpu.vector_store %arg11[%107, %c0_29], %106 {strides = array<i32>} : memref<64x32xf32, #tpu.memory_space<vmem>>, vector<8x32xf32>,
    %c3_i32 = arith.constant 3 : i32
    %c8_i32_30 = arith.constant 8 : i32
    %109 = arith.muli %c3_i32, %c8_i32_30 : i32
    %110 = tpu.assume_multiple %109, 8 : i32
    %111 = arith.index_cast %110 : i32 to index
    %c0_31 = arith.constant 0 : index
    %112 = vector.load %arg10[%111, %c0_31] : memref<64x96xf32, #tpu.memory_space<vmem>>, vector<8x96xf32>
    %cst_32 = arith.constant dense<0.000000e+00> : vector<8x96xf32>
    %113 = tpu.matmul %106, %7, %cst_32 {dimension_numbers = #tpu.dot_dimension_numbers<[1], [0], [0], [1], [0, 0, 1, 1], [], []>} : vector<8x32xf32>, vector<32x96xf32>, vector<8x96xf32> -> vector<8x96xf32>
    %114 = vector.extract_strided_slice %112 {offsets = [0, 0], sizes = [8, 32], strides = [1, 1]} : vector<8x96xf32> to vector<8x32xf32>
    %115 = vector.extract_strided_slice %113 {offsets = [0, 0], sizes = [8, 32], strides = [1, 1]} : vector<8x96xf32> to vector<8x32xf32>
    %116 = arith.addf %114, %115 : vector<8x32xf32>
    %117 = arith.negf %116 : vector<8x32xf32>
    %118 = math.exp %117 : vector<8x32xf32>
    %cst_33 = arith.constant 1.000000e+00 : f32
    %119 = vector.broadcast %cst_33 : f32 to vector<8x32xf32>
    %120 = arith.addf %119, %118 : vector<8x32xf32>
    %121 = arith.divf %119, %120 : vector<8x32xf32>
    %122 = vector.extract_strided_slice %112 {offsets = [0, 32], sizes = [8, 32], strides = [1, 1]} : vector<8x96xf32> to vector<8x32xf32>
    %123 = vector.extract_strided_slice %113 {offsets = [0, 32], sizes = [8, 32], strides = [1, 1]} : vector<8x96xf32> to vector<8x32xf32>
    %124 = arith.addf %122, %123 : vector<8x32xf32>
    %125 = arith.negf %124 : vector<8x32xf32>
    %126 = math.exp %125 : vector<8x32xf32>
    %cst_34 = arith.constant 1.000000e+00 : f32
    %127 = vector.broadcast %cst_34 : f32 to vector<8x32xf32>
    %128 = arith.addf %127, %126 : vector<8x32xf32>
    %129 = arith.divf %127, %128 : vector<8x32xf32>
    %130 = vector.extract_strided_slice %112 {offsets = [0, 64], sizes = [8, 32], strides = [1, 1]} : vector<8x96xf32> to vector<8x32xf32>
    %131 = vector.extract_strided_slice %113 {offsets = [0, 64], sizes = [8, 32], strides = [1, 1]} : vector<8x96xf32> to vector<8x32xf32>
    %132 = vector.broadcast %8 : vector<1x32xf32> to vector<8x32xf32>
    %133 = arith.addf %131, %132 : vector<8x32xf32>
    %134 = arith.mulf %121, %133 : vector<8x32xf32>
    %135 = arith.addf %130, %134 : vector<8x32xf32>
    %136 = math.tanh %135 : vector<8x32xf32>
    %137 = arith.subf %106, %136 : vector<8x32xf32>
    %138 = arith.mulf %129, %137 : vector<8x32xf32>
    %139 = arith.addf %136, %138 : vector<8x32xf32>
    %140 = arith.index_cast %110 : i32 to index
    %c0_35 = arith.constant 0 : index
    %141 = vector.load %arg11[%140, %c0_35] : memref<64x32xf32, #tpu.memory_space<vmem>>, vector<8x32xf32>
    tpu.vector_store %arg11[%140, %c0_35], %139 {strides = array<i32>} : memref<64x32xf32, #tpu.memory_space<vmem>>, vector<8x32xf32>,
    %c4_i32 = arith.constant 4 : i32
    %c8_i32_36 = arith.constant 8 : i32
    %142 = arith.muli %c4_i32, %c8_i32_36 : i32
    %143 = tpu.assume_multiple %142, 8 : i32
    %144 = arith.index_cast %143 : i32 to index
    %c0_37 = arith.constant 0 : index
    %145 = vector.load %arg10[%144, %c0_37] : memref<64x96xf32, #tpu.memory_space<vmem>>, vector<8x96xf32>
    %cst_38 = arith.constant dense<0.000000e+00> : vector<8x96xf32>
    %146 = tpu.matmul %139, %7, %cst_38 {dimension_numbers = #tpu.dot_dimension_numbers<[1], [0], [0], [1], [0, 0, 1, 1], [], []>} : vector<8x32xf32>, vector<32x96xf32>, vector<8x96xf32> -> vector<8x96xf32>
    %147 = vector.extract_strided_slice %145 {offsets = [0, 0], sizes = [8, 32], strides = [1, 1]} : vector<8x96xf32> to vector<8x32xf32>
    %148 = vector.extract_strided_slice %146 {offsets = [0, 0], sizes = [8, 32], strides = [1, 1]} : vector<8x96xf32> to vector<8x32xf32>
    %149 = arith.addf %147, %148 : vector<8x32xf32>
    %150 = arith.negf %149 : vector<8x32xf32>
    %151 = math.exp %150 : vector<8x32xf32>
    %cst_39 = arith.constant 1.000000e+00 : f32
    %152 = vector.broadcast %cst_39 : f32 to vector<8x32xf32>
    %153 = arith.addf %152, %151 : vector<8x32xf32>
    %154 = arith.divf %152, %153 : vector<8x32xf32>
    %155 = vector.extract_strided_slice %145 {offsets = [0, 32], sizes = [8, 32], strides = [1, 1]} : vector<8x96xf32> to vector<8x32xf32>
    %156 = vector.extract_strided_slice %146 {offsets = [0, 32], sizes = [8, 32], strides = [1, 1]} : vector<8x96xf32> to vector<8x32xf32>
    %157 = arith.addf %155, %156 : vector<8x32xf32>
    %158 = arith.negf %157 : vector<8x32xf32>
    %159 = math.exp %158 : vector<8x32xf32>
    %cst_40 = arith.constant 1.000000e+00 : f32
    %160 = vector.broadcast %cst_40 : f32 to vector<8x32xf32>
    %161 = arith.addf %160, %159 : vector<8x32xf32>
    %162 = arith.divf %160, %161 : vector<8x32xf32>
    %163 = vector.extract_strided_slice %145 {offsets = [0, 64], sizes = [8, 32], strides = [1, 1]} : vector<8x96xf32> to vector<8x32xf32>
    %164 = vector.extract_strided_slice %146 {offsets = [0, 64], sizes = [8, 32], strides = [1, 1]} : vector<8x96xf32> to vector<8x32xf32>
    %165 = vector.broadcast %8 : vector<1x32xf32> to vector<8x32xf32>
    %166 = arith.addf %164, %165 : vector<8x32xf32>
    %167 = arith.mulf %154, %166 : vector<8x32xf32>
    %168 = arith.addf %163, %167 : vector<8x32xf32>
    %169 = math.tanh %168 : vector<8x32xf32>
    %170 = arith.subf %139, %169 : vector<8x32xf32>
    %171 = arith.mulf %162, %170 : vector<8x32xf32>
    %172 = arith.addf %169, %171 : vector<8x32xf32>
    %173 = arith.index_cast %143 : i32 to index
    %c0_41 = arith.constant 0 : index
    %174 = vector.load %arg11[%173, %c0_41] : memref<64x32xf32, #tpu.memory_space<vmem>>, vector<8x32xf32>
    tpu.vector_store %arg11[%173, %c0_41], %172 {strides = array<i32>} : memref<64x32xf32, #tpu.memory_space<vmem>>, vector<8x32xf32>,
    %c5_i32 = arith.constant 5 : i32
    %c8_i32_42 = arith.constant 8 : i32
    %175 = arith.muli %c5_i32, %c8_i32_42 : i32
    %176 = tpu.assume_multiple %175, 8 : i32
    %177 = arith.index_cast %176 : i32 to index
    %c0_43 = arith.constant 0 : index
    %178 = vector.load %arg10[%177, %c0_43] : memref<64x96xf32, #tpu.memory_space<vmem>>, vector<8x96xf32>
    %cst_44 = arith.constant dense<0.000000e+00> : vector<8x96xf32>
    %179 = tpu.matmul %172, %7, %cst_44 {dimension_numbers = #tpu.dot_dimension_numbers<[1], [0], [0], [1], [0, 0, 1, 1], [], []>} : vector<8x32xf32>, vector<32x96xf32>, vector<8x96xf32> -> vector<8x96xf32>
    %180 = vector.extract_strided_slice %178 {offsets = [0, 0], sizes = [8, 32], strides = [1, 1]} : vector<8x96xf32> to vector<8x32xf32>
    %181 = vector.extract_strided_slice %179 {offsets = [0, 0], sizes = [8, 32], strides = [1, 1]} : vector<8x96xf32> to vector<8x32xf32>
    %182 = arith.addf %180, %181 : vector<8x32xf32>
    %183 = arith.negf %182 : vector<8x32xf32>
    %184 = math.exp %183 : vector<8x32xf32>
    %cst_45 = arith.constant 1.000000e+00 : f32
    %185 = vector.broadcast %cst_45 : f32 to vector<8x32xf32>
    %186 = arith.addf %185, %184 : vector<8x32xf32>
    %187 = arith.divf %185, %186 : vector<8x32xf32>
    %188 = vector.extract_strided_slice %178 {offsets = [0, 32], sizes = [8, 32], strides = [1, 1]} : vector<8x96xf32> to vector<8x32xf32>
    %189 = vector.extract_strided_slice %179 {offsets = [0, 32], sizes = [8, 32], strides = [1, 1]} : vector<8x96xf32> to vector<8x32xf32>
    %190 = arith.addf %188, %189 : vector<8x32xf32>
    %191 = arith.negf %190 : vector<8x32xf32>
    %192 = math.exp %191 : vector<8x32xf32>
    %cst_46 = arith.constant 1.000000e+00 : f32
    %193 = vector.broadcast %cst_46 : f32 to vector<8x32xf32>
    %194 = arith.addf %193, %192 : vector<8x32xf32>
    %195 = arith.divf %193, %194 : vector<8x32xf32>
    %196 = vector.extract_strided_slice %178 {offsets = [0, 64], sizes = [8, 32], strides = [1, 1]} : vector<8x96xf32> to vector<8x32xf32>
    %197 = vector.extract_strided_slice %179 {offsets = [0, 64], sizes = [8, 32], strides = [1, 1]} : vector<8x96xf32> to vector<8x32xf32>
    %198 = vector.broadcast %8 : vector<1x32xf32> to vector<8x32xf32>
    %199 = arith.addf %197, %198 : vector<8x32xf32>
    %200 = arith.mulf %187, %199 : vector<8x32xf32>
    %201 = arith.addf %196, %200 : vector<8x32xf32>
    %202 = math.tanh %201 : vector<8x32xf32>
    %203 = arith.subf %172, %202 : vector<8x32xf32>
    %204 = arith.mulf %195, %203 : vector<8x32xf32>
    %205 = arith.addf %202, %204 : vector<8x32xf32>
    %206 = arith.index_cast %176 : i32 to index
    %c0_47 = arith.constant 0 : index
    %207 = vector.load %arg11[%206, %c0_47] : memref<64x32xf32, #tpu.memory_space<vmem>>, vector<8x32xf32>
    tpu.vector_store %arg11[%206, %c0_47], %205 {strides = array<i32>} : memref<64x32xf32, #tpu.memory_space<vmem>>, vector<8x32xf32>,
    %c6_i32 = arith.constant 6 : i32
    %c8_i32_48 = arith.constant 8 : i32
    %208 = arith.muli %c6_i32, %c8_i32_48 : i32
    %209 = tpu.assume_multiple %208, 8 : i32
    %210 = arith.index_cast %209 : i32 to index
    %c0_49 = arith.constant 0 : index
    %211 = vector.load %arg10[%210, %c0_49] : memref<64x96xf32, #tpu.memory_space<vmem>>, vector<8x96xf32>
    %cst_50 = arith.constant dense<0.000000e+00> : vector<8x96xf32>
    %212 = tpu.matmul %205, %7, %cst_50 {dimension_numbers = #tpu.dot_dimension_numbers<[1], [0], [0], [1], [0, 0, 1, 1], [], []>} : vector<8x32xf32>, vector<32x96xf32>, vector<8x96xf32> -> vector<8x96xf32>
    %213 = vector.extract_strided_slice %211 {offsets = [0, 0], sizes = [8, 32], strides = [1, 1]} : vector<8x96xf32> to vector<8x32xf32>
    %214 = vector.extract_strided_slice %212 {offsets = [0, 0], sizes = [8, 32], strides = [1, 1]} : vector<8x96xf32> to vector<8x32xf32>
    %215 = arith.addf %213, %214 : vector<8x32xf32>
    %216 = arith.negf %215 : vector<8x32xf32>
    %217 = math.exp %216 : vector<8x32xf32>
    %cst_51 = arith.constant 1.000000e+00 : f32
    %218 = vector.broadcast %cst_51 : f32 to vector<8x32xf32>
    %219 = arith.addf %218, %217 : vector<8x32xf32>
    %220 = arith.divf %218, %219 : vector<8x32xf32>
    %221 = vector.extract_strided_slice %211 {offsets = [0, 32], sizes = [8, 32], strides = [1, 1]} : vector<8x96xf32> to vector<8x32xf32>
    %222 = vector.extract_strided_slice %212 {offsets = [0, 32], sizes = [8, 32], strides = [1, 1]} : vector<8x96xf32> to vector<8x32xf32>
    %223 = arith.addf %221, %222 : vector<8x32xf32>
    %224 = arith.negf %223 : vector<8x32xf32>
    %225 = math.exp %224 : vector<8x32xf32>
    %cst_52 = arith.constant 1.000000e+00 : f32
    %226 = vector.broadcast %cst_52 : f32 to vector<8x32xf32>
    %227 = arith.addf %226, %225 : vector<8x32xf32>
    %228 = arith.divf %226, %227 : vector<8x32xf32>
    %229 = vector.extract_strided_slice %211 {offsets = [0, 64], sizes = [8, 32], strides = [1, 1]} : vector<8x96xf32> to vector<8x32xf32>
    %230 = vector.extract_strided_slice %212 {offsets = [0, 64], sizes = [8, 32], strides = [1, 1]} : vector<8x96xf32> to vector<8x32xf32>
    %231 = vector.broadcast %8 : vector<1x32xf32> to vector<8x32xf32>
    %232 = arith.addf %230, %231 : vector<8x32xf32>
    %233 = arith.mulf %220, %232 : vector<8x32xf32>
    %234 = arith.addf %229, %233 : vector<8x32xf32>
    %235 = math.tanh %234 : vector<8x32xf32>
    %236 = arith.subf %205, %235 : vector<8x32xf32>
    %237 = arith.mulf %228, %236 : vector<8x32xf32>
    %238 = arith.addf %235, %237 : vector<8x32xf32>
    %239 = arith.index_cast %209 : i32 to index
    %c0_53 = arith.constant 0 : index
    %240 = vector.load %arg11[%239, %c0_53] : memref<64x32xf32, #tpu.memory_space<vmem>>, vector<8x32xf32>
    tpu.vector_store %arg11[%239, %c0_53], %238 {strides = array<i32>} : memref<64x32xf32, #tpu.memory_space<vmem>>, vector<8x32xf32>,
    %c7_i32 = arith.constant 7 : i32
    %c8_i32_54 = arith.constant 8 : i32
    %241 = arith.muli %c7_i32, %c8_i32_54 : i32
    %242 = tpu.assume_multiple %241, 8 : i32
    %243 = arith.index_cast %242 : i32 to index
    %c0_55 = arith.constant 0 : index
    %244 = vector.load %arg10[%243, %c0_55] : memref<64x96xf32, #tpu.memory_space<vmem>>, vector<8x96xf32>
    %cst_56 = arith.constant dense<0.000000e+00> : vector<8x96xf32>
    %245 = tpu.matmul %238, %7, %cst_56 {dimension_numbers = #tpu.dot_dimension_numbers<[1], [0], [0], [1], [0, 0, 1, 1], [], []>} : vector<8x32xf32>, vector<32x96xf32>, vector<8x96xf32> -> vector<8x96xf32>
    %246 = vector.extract_strided_slice %244 {offsets = [0, 0], sizes = [8, 32], strides = [1, 1]} : vector<8x96xf32> to vector<8x32xf32>
    %247 = vector.extract_strided_slice %245 {offsets = [0, 0], sizes = [8, 32], strides = [1, 1]} : vector<8x96xf32> to vector<8x32xf32>
    %248 = arith.addf %246, %247 : vector<8x32xf32>
    %249 = arith.negf %248 : vector<8x32xf32>
    %250 = math.exp %249 : vector<8x32xf32>
    %cst_57 = arith.constant 1.000000e+00 : f32
    %251 = vector.broadcast %cst_57 : f32 to vector<8x32xf32>
    %252 = arith.addf %251, %250 : vector<8x32xf32>
    %253 = arith.divf %251, %252 : vector<8x32xf32>
    %254 = vector.extract_strided_slice %244 {offsets = [0, 32], sizes = [8, 32], strides = [1, 1]} : vector<8x96xf32> to vector<8x32xf32>
    %255 = vector.extract_strided_slice %245 {offsets = [0, 32], sizes = [8, 32], strides = [1, 1]} : vector<8x96xf32> to vector<8x32xf32>
    %256 = arith.addf %254, %255 : vector<8x32xf32>
    %257 = arith.negf %256 : vector<8x32xf32>
    %258 = math.exp %257 : vector<8x32xf32>
    %cst_58 = arith.constant 1.000000e+00 : f32
    %259 = vector.broadcast %cst_58 : f32 to vector<8x32xf32>
    %260 = arith.addf %259, %258 : vector<8x32xf32>
    %261 = arith.divf %259, %260 : vector<8x32xf32>
    %262 = vector.extract_strided_slice %244 {offsets = [0, 64], sizes = [8, 32], strides = [1, 1]} : vector<8x96xf32> to vector<8x32xf32>
    %263 = vector.extract_strided_slice %245 {offsets = [0, 64], sizes = [8, 32], strides = [1, 1]} : vector<8x96xf32> to vector<8x32xf32>
    %264 = vector.broadcast %8 : vector<1x32xf32> to vector<8x32xf32>
    %265 = arith.addf %263, %264 : vector<8x32xf32>
    %266 = arith.mulf %253, %265 : vector<8x32xf32>
    %267 = arith.addf %262, %266 : vector<8x32xf32>
    %268 = math.tanh %267 : vector<8x32xf32>
    %269 = arith.subf %238, %268 : vector<8x32xf32>
    %270 = arith.mulf %261, %269 : vector<8x32xf32>
    %271 = arith.addf %268, %270 : vector<8x32xf32>
    %272 = arith.index_cast %242 : i32 to index
    %c0_59 = arith.constant 0 : index
    %273 = vector.load %arg11[%272, %c0_59] : memref<64x32xf32, #tpu.memory_space<vmem>>, vector<8x32xf32>
    tpu.vector_store %arg11[%272, %c0_59], %271 {strides = array<i32>} : memref<64x32xf32, #tpu.memory_space<vmem>>, vector<8x32xf32>,
    %c8_i32_60 = arith.constant 8 : i32
    %c0_61 = arith.constant 0 : index
    %c0_62 = arith.constant 0 : index
    %274 = vector.load %arg11[%c0_61, %c0_62] : memref<64x32xf32, #tpu.memory_space<vmem>>, vector<64x32xf32>
    %c0_63 = arith.constant 0 : index
    %c0_64 = arith.constant 0 : index
    %275 = vector.load %arg1[%c0_63, %c0_64] : memref<64x1xf32, #tpu.memory_space<vmem>>, vector<64x1xf32>
    %276 = vector.broadcast %275 : vector<64x1xf32> to vector<64x32xf32>
    %277 = arith.mulf %274, %276 : vector<64x32xf32>
    %c0_65 = arith.constant 0 : index
    %c0_66 = arith.constant 0 : index
    %278 = vector.load %arg7[%c0_65, %c0_66] : memref<32x128xf32, #tpu.memory_space<vmem>>, vector<32x128xf32>
    %cst_67 = arith.constant dense<0.000000e+00> : vector<64x128xf32>
    %279 = tpu.matmul %277, %278, %cst_67 {dimension_numbers = #tpu.dot_dimension_numbers<[1], [0], [0], [1], [0, 0, 1, 1], [], []>} : vector<64x32xf32>, vector<32x128xf32>, vector<64x128xf32> -> vector<64x128xf32>
    %c0_68 = arith.constant 0 : index
    %c0_69 = arith.constant 0 : index
    %280 = vector.load %arg8[%c0_68, %c0_69] : memref<1x128xf32, #tpu.memory_space<vmem>>, vector<1x128xf32>
    %281 = vector.broadcast %280 : vector<1x128xf32> to vector<64x128xf32>
    %282 = arith.addf %279, %281 : vector<64x128xf32>
    %c0_70 = arith.constant 0 : index
    %c0_71 = arith.constant 0 : index
    %283 = vector.load %arg9[%c0_70, %c0_71] : memref<64x128xf32, #tpu.memory_space<vmem>>, vector<64x128xf32>
    tpu.vector_store %arg9[%c0_70, %c0_71], %282 {strides = array<i32>} : memref<64x128xf32, #tpu.memory_space<vmem>>, vector<64x128xf32>,
    return
  }
}

</mosaic_0001>

<bundles_post_ra>
// kernel: tpu_custom_call.1
= control target key start
LH: loop header
LB: loop body
LE: loop exit
PB: predicated region body
PF: predicated region fallthrough
CT: control target
= control target key end

     0   :  { %vm52_vm0 = vcmask 261120   ;;  %s2017_s0 = inlined_call_operand.vmem [shape: f32[64,32], index: 0, kind: input, shape index: {}]   ;;  %s2018_s1 = inlined_call_operand.vmem [shape: f32[64,1], index: 1, kind: input, shape index: {}]   ;;  %s2019_s2 = inlined_call_operand.vmem [shape: f32[8,32], index: 2, kind: input, shape index: {}]   ;;  %s2020_s3 = inlined_call_operand.vmem [shape: f32[32,96], index: 3, kind: input, shape index: {}]   ;;  %s2021_s4 = inlined_call_operand.vmem [shape: f32[32,96], index: 4, kind: input, shape index: {}]   ;;  %s2022_s5 = inlined_call_operand.vmem [shape: f32[1,96], index: 5, kind: input, shape index: {}]   ;;  %s2023_s6 = inlined_call_operand.vmem [shape: f32[1,32], index: 6, kind: input, shape index: {}]   ;;  %s2024_s7 = inlined_call_operand.vmem [shape: f32[32,128], index: 7, kind: input, shape index: {}]   ;;  %s2025_s8 = inlined_call_operand.vmem [shape: f32[1,128], index: 8, kind: input, shape index: {}]   ;;  %s2026_s9 = inlined_call_operand.hbm [shape: f32[64,128], index: 9, kind: output, shape index: {}]  }
   0x1   :  { %v41_v0 = vld [vmem:[%s2020_s3] sm:$0xff]  ;;  %v42_v1 = vld [vmem:[%s2020_s3 + $0x8] sm:$0xff]  ;;  %v43_v2 = vld [vmem:[%s2020_s3 + $0x10] sm:$0xff] }
   0x2   :  { %v1543_v3 = vpack.c.bf16 %v42_v1, %v41_v0  ;;  %v44_v4 = vld [vmem:[%s2020_s3 + $0x18] sm:$0xff]  ;;  %v33_v5 = vld [vmem:[%s2017_s0] sm:$0xff]  ;;  %v192_v9 = vld [vmem:[%s2021_s4 + $0x8] sm:$0xff] }
   0x3   :  { %v37_v6 = vld [vmem:[%s2017_s0 + $0x20] sm:$0xff]  ;;  %v1547_v7 = vpack.c.bf16 %v44_v4, %v43_v2  ;;  %1423 = vmatprep.mubr.msk.f32.mxu0 %vm52_vm0, %v33_v5 }
   0x4   :  { %1429 = vmatprep.mubr.msk.f32.mxu1 %vm52_vm0, %v37_v6  ;;  %1544 = vmatprep.subr.bf16.mxu0 %v1543_v3  ;;  %v191_v8 = vld [vmem:[%s2021_s4] sm:$0xff] }
   0x5   :  { %1607 = vmatprep.subr.bf16.mxu1 %v1543_v3  ;;  %1546 = vmatpush3.bf16.msra.mxu0 %v1543_v3  ;;  %v1327_v10 = vld [vmem:[%s2023_s6] ss:$0 sm:$0xff] }
   0x6   :  { %1609 = vmatpush3.bf16.msra.mxu1 %v1543_v3  ;;  %1548 = vmatprep.subr.bf16.mxu0 %v1547_v7 }
   0x7   :  { %1608 = vmatprep.subr.bf16.mxu1 %v1547_v7 }
   0x8   :  { %14 = vsyncpa [#allocation5], 0  ;;  %s1695_s26 = smov 64   ;;  %v34_v11 = vld [vmem:[%s2017_s0 + $0x8] sm:$0xff]  ;;  %v1791_v13 = vpack.c.bf16 %v192_v9, %v191_v8  ;;  %v1696_v14 = vmov 0.0|0.0   ;;  %v39_v15 = vld [vmem:[%s2017_s0 + $0x30] sm:$0xff] }
   0x9   :  { %283 = vrot.lane.b32.xlu0 %v1327_v10, %s1695_s26  ;;  %1550 = vmatpush3.bf16.msra.mxu0 %v1547_v7  ;;  %v38_v12 = vld [vmem:[%s2017_s0 + $0x28] sm:$0xff]  ;;  %v193_v16 = vld [vmem:[%s2021_s4 + $0x10] sm:$0xff]  ;;  %v194_v17 = vld [vmem:[%s2021_s4 + $0x18] sm:$0xff]  ;;  %vm1697_vm1 = vmmov 0   ;;  %v1698_v20 = vmov 0.0   ;;  %vm182_vm2 = vcmask 785408  }
   0xa   :  { %1610 = vmatpush3.bf16.msra.mxu1 %v1547_v7  ;;  %1563 = vmatprep.subr.bf16.mxu0 %v1696_v14  ;;  %v40_v18 = vld [vmem:[%s2017_s0 + $0x38] sm:$0xff]  ;;  %v1811_v19 = vpack.c.bf16 %v194_v17, %v193_v16  ;;  %v196_v21 = vld [vmem:[%s2019_s2] sm:$0xff]  ;;  %s1700_s19 = smov 96   ;;  %v35_v8 = vld [vmem:[%s2017_s0 + $0x10] sm:$0xff]  ;;  %s1702_s21 = smov [#allocation4]  }
   0xb   :  { %1551 = vmatprep.subr.bf16.mxu1 %v1696_v14  ;;  %v1836_v22 = vld [vmem:[%s2022_s5] ss:$0 sm:$0xff]  ;;  %s1699_s5 = smov 32   ;;  %v36_v9 = vld [vmem:[%s2017_s0 + $0x18] sm:$0xff] }
   0xc   :  { %1424 = vmatmul.mubr.msk.f32.vlgmr.msra.gmra.mrb[0].mxu0 %vm52_vm0, %v34_v11 }
   0xd   :  { %1430 = vmatmul.mubr.msk.f32.vlgmr.msra.gmra.mrb[0].mxu1 %vm52_vm0, %v38_v12  ;;  %1565 = vmatpush3.bf16.msra.mxu0 %v1791_v13 }
   0xe   :  { %1553 = vmatpush3.bf16.msra.mxu1 %v1791_v13  ;;  %1432 = vmatprep.mubr.msk.f32.mxu1 %vm52_vm0, %v39_v15 }
   0xf   :  { %1554 = vmatprep.subr.bf16.mxu1 %v1696_v14  ;;  %1566 = vmatprep.subr.bf16.mxu0 %v1696_v14 }
  0x10   :  { %1426 = vmatprep.mubr.msk.f32.mxu0 %vm52_vm0, %v35_v8 }
  0x11   :  { %1433 = vmatmul.mubr.msk.f32.gmra.mrb[2].mxu1 %vm52_vm0, %v40_v18  ;;  %1568 = vmatpush3.bf16.msra.mxu0 %v1811_v19 }
  0x12   :  { %1556 = vmatpush3.bf16.msra.mxu1 %v1811_v19  ;;  %1443 = vmatprep.mubr.msk.f32.mxu1 %vm1697_vm1, %v1698_v20 }
  0x13   :  { %1557 = vmatprep.subr.bf16.mxu1 %v1696_v14  ;;  %1575 = vmatprep.subr.bf16.mxu0 %v1696_v14 }
  0x14   :  { %1427 = vmatmul.mubr.msk.f32.gmra.mrb[2].mxu0 %vm52_vm0, %v36_v9 }
  0x15   :  { %1444 = vmatmul.mubr.msk.f32.vlgmr.msra.gmra.mrb[4].mxu1 %vm52_vm0, %v196_v21  ;;  %1465 = vmatprep.mubr.msk.f32.mxu0 %vm1697_vm1, %v1698_v20 }
  0x16   :  { %1559 = vmatpush3.bf16.msra.mxu1 %v1791_v13  ;;  %1454 = vmatprep.mubr.msk.f32.mxu1 %vm1697_vm1, %v1698_v20 }
  0x17   :  { %1560 = vmatprep.subr.bf16.mxu1 %v1696_v14 }
  0x1a   :  { %1562 = vmatpush3.bf16.msra.mxu1 %v1811_v19 }
  0x1b   :  { %1569 = vmatprep.subr.bf16.mxu1 %v1696_v14 }
  0x7b   :  { %v1848_v35 = vpop.permute.xlu0 %283 }
  0xdf   :  { %v1425_v23 = vpop.f32.mrb[0].mxu0 }
  0xe0   :  { %v1431_v24 = vpop.f32.mrb[0].mxu1  ;;  %v149_v25 = vadd.f32 %v1425_v23, %v1836_v22  ;;  %v143_v27 = vpop.f32.mrb[1].mxu0 }
  0xe1   :  { %v169_v26 = vadd.f32 %v1431_v24, %v1836_v22  ;;  %v163_v28 = vpop.f32.mrb[1].mxu1  ;;  %v144_v29 = vadd.f32 %v1836_v22, %v143_v27 }
  0xe2   :  { %v164_v30 = vadd.f32 %v1836_v22, %v163_v28  ;;  %184 = vst.msk [vmem:[#allocation2 + $0x8] sm:$0xff] %vm182_vm2, %v149_v25 }
  0xe3   :  { %188 = vst.msk [vmem:[#allocation2 + $0x28] sm:$0xff] %vm182_vm2, %v169_v26  ;;  %183 = vst.msk [vmem:[#allocation2] sm:$0xff] %vm182_vm2, %v144_v29 }
  0xe4   :  { %187 = vst.msk [vmem:[#allocation2 + $0x20] sm:$0xff] %vm182_vm2, %v164_v30  ;;  %v1434_v31 = vpop.f32.mrb[2].mxu1 }
  0xe5   :  { %v179_v32 = vadd.f32 %v1434_v31, %v1836_v22  ;;  %v173_v33 = vpop.f32.mrb[3].mxu1 }
  0xe6   :  { %v174_v34 = vadd.f32 %v1836_v22, %v173_v33 }
  0xe7   :  { %190 = vst.msk [vmem:[#allocation2 + $0x38] sm:$0xff] %vm182_vm2, %v179_v32  ;;  %v1428_v16 = vpop.f32.mrb[2].mxu0 }
  0xe8   :  { %189 = vst.msk [vmem:[#allocation2 + $0x30] sm:$0xff] %vm182_vm2, %v174_v34  ;;  %v267_v36 = vpop.f32.mrb[4].mxu1  ;;  %v159_v17 = vadd.f32 %v1428_v16, %v1836_v22  ;;  %v153_v18 = vpop.f32.mrb[3].mxu0 }
  0xe9   :  { %v286_v37 = vadd.f32 %v1848_v35, %v267_v36  ;;  %v1445_v38 = vpop.f32.mrb[5].mxu1  ;;  %v319_v60 = vld [vmem:[#allocation2 + $0x8] sm:$0xff] }
  0xea   :  { %v197_v39 = vld [vmem:[#allocation2] sm:$0xff]  ;;  %186 = vst.msk [vmem:[#allocation2 + $0x18] sm:$0xff] %vm182_vm2, %v159_v17 }
  0xeb   :  { %288 = vrot.lane.b32.xlu0 %v286_v37, %s1695_s26  ;;  %v271_v40 = vadd.f32 %v267_v36, %v197_v39 }
  0xed   :  { %v1326_v41 = vmul.f32 -1.442695, %v271_v40 }
  0xef   :  { %1623 = vpow2.f32 %v1326_v41 }
  0xf9   :  { %v1624_v42 = vpop.eup %1623 }
  0xfa   :  { %v275_v43 = vadd.f32 1.0, %v1624_v42 }
  0xfc   :  { %1625 = vrcp.f32 %v275_v43 }
 0x106   :  { %v1626_v44 = vpop.eup %1625 }
 0x15d   :  { %v289_v45 = vpop.permute.xlu0 %288 }
 0x15e   :  { %v291_v46 = vmul.f32 %v1626_v44, %v289_v45 }
 0x160   :  { %293 = vrot.lane.b32.xlu1 %v291_v46, %s1695_s26 }
 0x1d2   :  { %v294_v47 = vpop.permute.xlu1 %293 }
 0x1d3   :  { %v296_v48 = vadd.f32 %v294_v47, %v197_v39  ;;  %v539_v47 = vld [vmem:[#allocation2 + $0x18] sm:$0xff] }
 0x1d5   :  { %1627 = vtanh.f32 %v296_v48 }
 0x1df   :  { %v1628_v49 = vpop.eup %1627 }
 0x1e0   :  { %299 = vrot.lane.b32.xlu1 %v1628_v49, %s1695_s26 }
 0x252   :  { %v300_v50 = vpop.permute.xlu1 %299 }
 0x253   :  { %v302_v51 = vsub.f32 %v196_v21, %v300_v50  ;;  %v154_v21 = vadd.f32 %v1836_v22, %v153_v18 }
 0x255   :  { %304 = vrot.lane.b32.xlu0 %v302_v51, %s1699_s5  ;;  %185 = vst.msk [vmem:[#allocation2 + $0x10] sm:$0xff] %vm182_vm2, %v154_v21 }
 0x25c   :  { %v429_v26 = vld [vmem:[#allocation2 + $0x10] sm:$0xff] }
 0x2c7   :  { %v305_v52 = vpop.permute.xlu0 %304 }
 0x2c8   :  { %v307_v53 = vmul.f32 %v1626_v44, %v305_v52 }
 0x2ca   :  { %309 = vrot.lane.b32.xlu1 %v307_v53, %s1699_s5 }
 0x33c   :  { %v310_v54 = vpop.permute.xlu1 %309 }
 0x33d   :  { %v312_v55 = vadd.f32 %v1628_v49, %v310_v54 }
 0x33f   :  { %314 = vrot.lane.b32.xlu0 %v312_v55, %s1695_s26 }
 0x3b1   :  { %v315_v56 = vpop.permute.xlu0 %314 }
 0x3b2   :  { %317 = vst.msk [vmem:[#allocation3] sm:$0xff] %vm52_vm0, %v315_v56  ;;  %1455 = vmatmul.mubr.msk.f32.vlgmr.msra.gmra.mrb[6].mxu1 %vm52_vm0, %v315_v56 }
 0x3b3   :  { %1571 = vmatpush3.bf16.msra.mxu1 %v1791_v13  ;;  %1476 = vmatprep.mubr.msk.f32.mxu1 %vm1697_vm1, %v1698_v20 }
 0x3b4   :  { %1572 = vmatprep.subr.bf16.mxu1 %v1696_v14 }
 0x3b7   :  { %1574 = vmatpush3.bf16.msra.mxu1 %v1811_v19 }
 0x3b8   :  { %1581 = vmatprep.subr.bf16.mxu1 %v1696_v14 }
 0x485   :  { %v388_v57 = vpop.f32.mrb[6].mxu1 }
 0x486   :  { %v399_v58 = vadd.f32 %v388_v57, %v1848_v35  ;;  %v1456_v59 = vpop.f32.mrb[7].mxu1  ;;  %v392_v61 = vadd.f32 %v388_v57, %v319_v60 }
 0x488   :  { %401 = vrot.lane.b32.xlu1 %v399_v58, %s1695_s26  ;;  %v1329_v62 = vmul.f32 -1.442695, %v392_v61 }
 0x48a   :  { %1629 = vpow2.f32 %v1329_v62 }
 0x494   :  { %v1630_v63 = vpop.eup %1629 }
 0x495   :  { %v396_v0 = vadd.f32 1.0, %v1630_v63 }
 0x497   :  { %1631 = vrcp.f32 %v396_v0 }
 0x4a1   :  { %v1632_v1 = vpop.eup %1631 }
 0x4fa   :  { %v402_v2 = vpop.permute.xlu1 %401 }
 0x4fb   :  { %v404_v3 = vmul.f32 %v1632_v1, %v402_v2 }
 0x4fd   :  { %406 = vrot.lane.b32.xlu0 %v404_v3, %s1695_s26  ;;  %v649_v3 = vld [vmem:[#allocation2 + $0x20] sm:$0xff] }
 0x56f   :  { %v407_v4 = vpop.permute.xlu0 %406 }
 0x570   :  { %v409_v5 = vadd.f32 %v407_v4, %v319_v60 }
 0x572   :  { %1633 = vtanh.f32 %v409_v5 }
 0x57c   :  { %v1634_v6 = vpop.eup %1633 }
 0x57d   :  { %v411_v7 = vsub.f32 %v312_v55, %v1634_v6 }
 0x57f   :  { %413 = vrot.lane.b32.xlu1 %v411_v7, %s1700_s19 }
 0x5f1   :  { %v414_v10 = vpop.permute.xlu1 %413 }
 0x5f2   :  { %v416_v11 = vmul.f32 %v1632_v1, %v414_v10 }
 0x5f4   :  { %418 = vrot.lane.b32.xlu0 %v416_v11, %s1699_s5 }
 0x666   :  { %v419_v12 = vpop.permute.xlu0 %418 }
 0x667   :  { %v421_v15 = vadd.f32 %v1634_v6, %v419_v12 }
 0x669   :  { %423 = vrot.lane.b32.xlu1 %v421_v15, %s1695_s26 }
 0x6db   :  { %v424_v23 = vpop.permute.xlu1 %423 }
 0x6dc   :  { %427 = vst.msk [vmem:[#allocation3 + $0x8] sm:$0xff] %vm52_vm0, %v424_v23  ;;  %1466 = vmatmul.mubr.msk.f32.vlgmr.msra.gmra.mrb[4].mxu0 %vm52_vm0, %v424_v23 }
 0x6dd   :  { %1577 = vmatpush3.bf16.msra.mxu0 %v1791_v13  ;;  %1487 = vmatprep.mubr.msk.f32.mxu0 %vm1697_vm1, %v1698_v20 }
 0x6de   :  { %1578 = vmatprep.subr.bf16.mxu0 %v1696_v14 }
 0x6e1   :  { %1580 = vmatpush3.bf16.msra.mxu0 %v1811_v19 }
 0x6e2   :  { %1587 = vmatprep.subr.bf16.mxu0 %v1696_v14 }
 0x7af   :  { %v498_v22 = vpop.f32.mrb[4].mxu0 }
 0x7b0   :  { %v509_v24 = vadd.f32 %v498_v22, %v1848_v35  ;;  %v1467_v25 = vpop.f32.mrb[5].mxu0  ;;  %v502_v27 = vadd.f32 %v498_v22, %v429_v26 }
 0x7b2   :  { %511 = vrot.lane.b32.xlu0 %v509_v24, %s1695_s26  ;;  %v1331_v28 = vmul.f32 -1.442695, %v502_v27  ;;  %v759_v27 = vld [vmem:[#allocation2 + $0x28] sm:$0xff] }
 0x7b4   :  { %1635 = vpow2.f32 %v1331_v28 }
 0x7be   :  { %v1636_v29 = vpop.eup %1635 }
 0x7bf   :  { %v506_v30 = vadd.f32 1.0, %v1636_v29 }
 0x7c1   :  { %1637 = vrcp.f32 %v506_v30 }
 0x7cb   :  { %v1638_v31 = vpop.eup %1637 }
 0x824   :  { %v512_v32 = vpop.permute.xlu0 %511 }
 0x825   :  { %v514_v33 = vmul.f32 %v1638_v31, %v512_v32 }
 0x827   :  { %516 = vrot.lane.b32.xlu1 %v514_v33, %s1695_s26 }
 0x899   :  { %v517_v34 = vpop.permute.xlu1 %516 }
 0x89a   :  { %v519_v36 = vadd.f32 %v517_v34, %v429_v26 }
 0x89c   :  { %1639 = vtanh.f32 %v519_v36 }
 0x8a6   :  { %v1640_v37 = vpop.eup %1639 }
 0x8a7   :  { %v521_v38 = vsub.f32 %v421_v15, %v1640_v37 }
 0x8a9   :  { %523 = vrot.lane.b32.xlu0 %v521_v38, %s1700_s19 }
 0x91b   :  { %v524_v39 = vpop.permute.xlu0 %523 }
 0x91c   :  { %v526_v40 = vmul.f32 %v1638_v31, %v524_v39 }
 0x91e   :  { %528 = vrot.lane.b32.xlu1 %v526_v40, %s1699_s5 }
 0x990   :  { %v529_v41 = vpop.permute.xlu1 %528 }
 0x991   :  { %v531_v42 = vadd.f32 %v1640_v37, %v529_v41 }
 0x993   :  { %533 = vrot.lane.b32.xlu0 %v531_v42, %s1695_s26 }
 0xa05   :  { %v534_v43 = vpop.permute.xlu0 %533 }
 0xa06   :  { %537 = vst.msk [vmem:[#allocation3 + $0x10] sm:$0xff] %vm52_vm0, %v534_v43  ;;  %1477 = vmatmul.mubr.msk.f32.vlgmr.msra.gmra.mrb[8].mxu1 %vm52_vm0, %v534_v43 }
 0xa07   :  { %1583 = vmatpush3.bf16.msra.mxu1 %v1791_v13  ;;  %1498 = vmatprep.mubr.msk.f32.mxu1 %vm1697_vm1, %v1698_v20 }
 0xa08   :  { %1584 = vmatprep.subr.bf16.mxu1 %v1696_v14 }
 0xa0b   :  { %1586 = vmatpush3.bf16.msra.mxu1 %v1811_v19 }
 0xa0c   :  { %1593 = vmatprep.subr.bf16.mxu1 %v1696_v14 }
 0xad9   :  { %v608_v44 = vpop.f32.mrb[8].mxu1 }
 0xada   :  { %v619_v45 = vadd.f32 %v608_v44, %v1848_v35  ;;  %v1478_v46 = vpop.f32.mrb[9].mxu1  ;;  %v612_v48 = vadd.f32 %v608_v44, %v539_v47  ;;  %v869_v44 = vld [vmem:[#allocation2 + $0x30] sm:$0xff] }
 0xadc   :  { %621 = vrot.lane.b32.xlu1 %v619_v45, %s1695_s26  ;;  %v1333_v49 = vmul.f32 -1.442695, %v612_v48 }
 0xade   :  { %1641 = vpow2.f32 %v1333_v49 }
 0xae8   :  { %v1642_v50 = vpop.eup %1641 }
 0xae9   :  { %v616_v51 = vadd.f32 1.0, %v1642_v50 }
 0xaeb   :  { %1643 = vrcp.f32 %v616_v51 }
 0xaf5   :  { %v1644_v52 = vpop.eup %1643 }
 0xb4e   :  { %v622_v53 = vpop.permute.xlu1 %621 }
 0xb4f   :  { %v624_v54 = vmul.f32 %v1644_v52, %v622_v53 }
 0xb51   :  { %626 = vrot.lane.b32.xlu0 %v624_v54, %s1695_s26 }
 0xbc3   :  { %v627_v55 = vpop.permute.xlu0 %626 }
 0xbc4   :  { %v629_v56 = vadd.f32 %v627_v55, %v539_v47 }
 0xbc6   :  { %1645 = vtanh.f32 %v629_v56 }
 0xbd0   :  { %v1646_v57 = vpop.eup %1645 }
 0xbd1   :  { %v631_v58 = vsub.f32 %v531_v42, %v1646_v57 }
 0xbd3   :  { %633 = vrot.lane.b32.xlu1 %v631_v58, %s1700_s19 }
 0xc45   :  { %v634_v59 = vpop.permute.xlu1 %633 }
 0xc46   :  { %v636_v60 = vmul.f32 %v1644_v52, %v634_v59 }
 0xc48   :  { %638 = vrot.lane.b32.xlu0 %v636_v60, %s1699_s5 }
 0xcba   :  { %v639_v61 = vpop.permute.xlu0 %638 }
 0xcbb   :  { %v641_v62 = vadd.f32 %v1646_v57, %v639_v61 }
 0xcbd   :  { %643 = vrot.lane.b32.xlu1 %v641_v62, %s1695_s26 }
 0xd2f   :  { %v644_v63 = vpop.permute.xlu1 %643 }
 0xd30   :  { %647 = vst.msk [vmem:[#allocation3 + $0x18] sm:$0xff] %vm52_vm0, %v644_v63  ;;  %1488 = vmatmul.mubr.msk.f32.vlgmr.msra.gmra.mrb[6].mxu0 %vm52_vm0, %v644_v63 }
 0xd31   :  { %1589 = vmatpush3.bf16.msra.mxu0 %v1791_v13  ;;  %1509 = vmatprep.mubr.msk.f32.mxu0 %vm1697_vm1, %v1698_v20 }
 0xd32   :  { %1590 = vmatprep.subr.bf16.mxu0 %v1696_v14 }
 0xd35   :  { %1592 = vmatpush3.bf16.msra.mxu0 %v1811_v19 }
 0xe03   :  { %v718_v0 = vpop.f32.mrb[6].mxu0 }
 0xe04   :  { %v729_v1 = vadd.f32 %v718_v0, %v1848_v35  ;;  %v1489_v2 = vpop.f32.mrb[7].mxu0  ;;  %v722_v4 = vadd.f32 %v718_v0, %v649_v3  ;;  %v979_v0 = vld [vmem:[#allocation2 + $0x38] sm:$0xff] }
 0xe06   :  { %731 = vrot.lane.b32.xlu0 %v729_v1, %s1695_s26  ;;  %v1335_v5 = vmul.f32 -1.442695, %v722_v4 }
 0xe08   :  { %1647 = vpow2.f32 %v1335_v5 }
 0xe12   :  { %v1648_v6 = vpop.eup %1647 }
 0xe13   :  { %v726_v7 = vadd.f32 1.0, %v1648_v6 }
 0xe15   :  { %1649 = vrcp.f32 %v726_v7 }
 0xe1f   :  { %v1650_v8 = vpop.eup %1649 }
 0xe78   :  { %v732_v9 = vpop.permute.xlu0 %731 }
 0xe79   :  { %v734_v10 = vmul.f32 %v1650_v8, %v732_v9 }
 0xe7b   :  { %736 = vrot.lane.b32.xlu1 %v734_v10, %s1695_s26 }
 0xeed   :  { %v737_v11 = vpop.permute.xlu1 %736 }
 0xeee   :  { %v739_v12 = vadd.f32 %v737_v11, %v649_v3 }
 0xef0   :  { %1651 = vtanh.f32 %v739_v12  ;;  %v1096_v12 = vld [vmem:[%s2018_s1] sm:$0xff] }
 0xefa   :  { %v1652_v15 = vpop.eup %1651 }
 0xefb   :  { %v741_v16 = vsub.f32 %v641_v62, %v1652_v15 }
 0xefd   :  { %743 = vrot.lane.b32.xlu0 %v741_v16, %s1700_s19  ;;  %v1099_v16 = vld [vmem:[%s2018_s1 + $0x18] sm:$0xff] }
 0xf6f   :  { %v744_v17 = vpop.permute.xlu0 %743 }
 0xf70   :  { %v746_v18 = vmul.f32 %v1650_v8, %v744_v17  ;;  %v1701_v8 = vmov 0   ;;  %v1101_v17 = vld [vmem:[%s2018_s1 + $0x28] sm:$0xff] }
 0xf71   :  { %1621 = vset.pattern.permute.xlu1 %v1701_v8  ;;  %1622 = vset.pattern.permute.xlu0 %v1701_v8 }
 0xf72   :  { %748 = vrot.lane.b32.xlu1 %v746_v18, %s1699_s5  ;;  %v1102_v18 = vld [vmem:[%s2018_s1 + $0x30] sm:$0xff] }
 0xfe4   :  { %v749_v21 = vpop.permute.xlu1 %748 }
 0xfe5   :  { %v751_v23 = vadd.f32 %v1652_v15, %v749_v21  ;;  %v1098_v15 = vld [vmem:[%s2018_s1 + $0x10] sm:$0xff]  ;;  %v1152_v21 = vld [vmem:[%s2024_s7] sm:$0xff] }
 0xfe7   :  { %753 = vrot.lane.b32.xlu0 %v751_v23, %s1695_s26 }
0x1059   :  { %v754_v22 = vpop.permute.xlu0 %753 }
0x105a   :  { %757 = vst.msk [vmem:[#allocation3 + $0x20] sm:$0xff] %vm52_vm0, %v754_v22  ;;  %1499 = vmatmul.mubr.msk.f32.vlgmr.msra.gmra.mrb[10].mxu1 %vm52_vm0, %v754_v22  ;;  %v1154_v22 = vld [vmem:[%s2024_s7 + $0x10] sm:$0xff] }
0x105b   :  { %1595 = vmatpush3.bf16.msra.mxu1 %v1791_v13  ;;  %1520 = vmatprep.mubr.msk.f32.mxu1 %vm1697_vm1, %v1698_v20 }
0x105c   :  { %1596 = vmatprep.subr.bf16.mxu1 %v1696_v14 }
0x105f   :  { %1598 = vmatpush3.bf16.msra.mxu1 %v1811_v19 }
0x112d   :  { %v828_v24 = vpop.f32.mrb[10].mxu1 }
0x112e   :  { %v839_v25 = vadd.f32 %v828_v24, %v1848_v35  ;;  %v1500_v26 = vpop.f32.mrb[11].mxu1  ;;  %v832_v28 = vadd.f32 %v828_v24, %v759_v27 }
0x1130   :  { %841 = vrot.lane.b32.xlu1 %v839_v25, %s1695_s26  ;;  %v1337_v29 = vmul.f32 -1.442695, %v832_v28  ;;  %v1155_v25 = vld [vmem:[%s2024_s7 + $0x18] sm:$0xff] }
0x1131   :  { %v1603_v26 = vpack.c.bf16 %v1155_v25, %v1154_v22 }
0x1132   :  { %1653 = vpow2.f32 %v1337_v29  ;;  %v1097_v29 = vld [vmem:[%s2018_s1 + $0x8] sm:$0xff] }
0x113c   :  { %v1654_v30 = vpop.eup %1653 }
0x113d   :  { %v836_v31 = vadd.f32 1.0, %v1654_v30  ;;  %v1100_v30 = vld [vmem:[%s2018_s1 + $0x20] sm:$0xff] }
0x113f   :  { %1655 = vrcp.f32 %v836_v31 }
0x1149   :  { %v1656_v13 = vpop.eup %1655 }
0x11a2   :  { %v842_v32 = vpop.permute.xlu1 %841 }
0x11a3   :  { %v844_v20 = vmul.f32 %v1656_v13, %v842_v32 }
0x11a5   :  { %846 = vrot.lane.b32.xlu0 %v844_v20, %s1695_s26 }
0x1217   :  { %v847_v14 = vpop.permute.xlu0 %846 }
0x1218   :  { %v849_v19 = vadd.f32 %v847_v14, %v759_v27 }
0x121a   :  { %1657 = vtanh.f32 %v849_v19  ;;  %v1103_v19 = vld [vmem:[%s2018_s1 + $0x38] sm:$0xff] }
0x1224   :  { %v1658_v33 = vpop.eup %1657 }
0x1225   :  { %v851_v34 = vsub.f32 %v751_v23, %v1658_v33  ;;  %v1153_v23 = vld [vmem:[%s2024_s7 + $0x8] sm:$0xff] }
0x1226   :  { %v1599_v24 = vpack.c.bf16 %v1153_v23, %v1152_v21 }
0x1227   :  { %853 = vrot.lane.b32.xlu1 %v851_v34, %s1700_s19 }
0x1228   :  { %1600 = vmatprep.subr.bf16.mxu0 %v1599_v24 }
0x1299   :  { %v854_v36 = vpop.permute.xlu1 %853 }
0x129a   :  { %v856_v37 = vmul.f32 %v1656_v13, %v854_v36  ;;  %v1088_v13 = vld [vmem:[#allocation3] sm:$0xff]  ;;  %v1089_v36 = vld [vmem:[#allocation3 + $0x8] sm:$0xff] }
0x129c   :  { %858 = vrot.lane.b32.xlu0 %v856_v37, %s1699_s5 }
0x130e   :  { %v859_v38 = vpop.permute.xlu0 %858 }
0x130f   :  { %v861_v39 = vadd.f32 %v1658_v33, %v859_v38  ;;  %v1090_v38 = vld [vmem:[#allocation3 + $0x10] sm:$0xff] }
0x1311   :  { %863 = vrot.lane.b32.xlu1 %v861_v39, %s1695_s26 }
0x1383   :  { %v864_v40 = vpop.permute.xlu1 %863 }
0x1384   :  { %867 = vst.msk [vmem:[#allocation3 + $0x28] sm:$0xff] %vm52_vm0, %v864_v40  ;;  %1510 = vmatmul.mubr.msk.f32.vlgmr.msra.gmra.mrb[8].mxu0 %vm52_vm0, %v864_v40 }
0x1385   :  { %1602 = vmatpush3.bf16.msra.mxu0 %v1599_v24 }
0x1386   :  { %1604 = vmatprep.subr.bf16.mxu0 %v1603_v26 }
0x1389   :  { %1606 = vmatpush3.bf16.msra.mxu0 %v1603_v26 }
0x1457   :  { %v938_v41 = vpop.f32.mrb[8].mxu0 }
0x1458   :  { %v949_v42 = vadd.f32 %v938_v41, %v1848_v35  ;;  %v1511_v43 = vpop.f32.mrb[9].mxu0  ;;  %v942_v45 = vadd.f32 %v938_v41, %v869_v44 }
0x1459   :  { %v1092_v43 = vld [vmem:[#allocation3 + $0x20] sm:$0xff] }
0x145a   :  { %951 = vrot.lane.b32.xlu0 %v949_v42, %s1695_s26  ;;  %v1339_v46 = vmul.f32 -1.442695, %v942_v45  ;;  %v1091_v42 = vld [vmem:[#allocation3 + $0x18] sm:$0xff] }
0x145c   :  { %1659 = vpow2.f32 %v1339_v46 }
0x1466   :  { %v1660_v47 = vpop.eup %1659 }
0x1467   :  { %v946_v48 = vadd.f32 1.0, %v1660_v47 }
0x1469   :  { %1661 = vrcp.f32 %v946_v48  ;;  %v1093_v48 = vld [vmem:[#allocation3 + $0x28] sm:$0xff] }
0x1473   :  { %v1662_v49 = vpop.eup %1661 }
0x14cc   :  { %v952_v50 = vpop.permute.xlu0 %951 }
0x14cd   :  { %v954_v51 = vmul.f32 %v1662_v49, %v952_v50 }
0x14cf   :  { %956 = vrot.lane.b32.xlu1 %v954_v51, %s1695_s26 }
0x1541   :  { %v957_v52 = vpop.permute.xlu1 %956 }
0x1542   :  { %v959_v53 = vadd.f32 %v957_v52, %v869_v44 }
0x1544   :  { %1663 = vtanh.f32 %v959_v53 }
0x154e   :  { %v1664_v54 = vpop.eup %1663 }
0x154f   :  { %v961_v55 = vsub.f32 %v861_v39, %v1664_v54 }
0x1551   :  { %963 = vrot.lane.b32.xlu0 %v961_v55, %s1700_s19 }
0x15c3   :  { %v964_v56 = vpop.permute.xlu0 %963 }
0x15c4   :  { %v966_v57 = vmul.f32 %v1662_v49, %v964_v56  ;;  %v1342_v56 = vld [vmem:[%s2025_s8] ss:$0 sm:$0xff]  ;;  %s1305_s8 = sshll.u32 %s1702_s21, 4  ;;  %s1306_s8 = int_to_ptr.vmem [resolvable:$true] %s1305_s8 }
0x15c5   :  { %s1671_s22 = scalar_lea.vmem %s1306_s8, 1024  ;;  %p1676_p1 = scmp.lt.s32.totalorder %s1306_s8, %s1306_s8 }
0x15c6   :  { %968 = vrot.lane.b32.xlu1 %v966_v57, %s1699_s5  ;;  %p1672_p0 = scmp.ne.s32.totalorder %s1306_s8, %s1671_s22  ;;  %p1677_p2 = scmp.lt.s32.totalorder %s1671_s22, %s1671_s22 }
0x15c8   :  { %p1678_p3 = por %p1677_p2, %p1676_p1 }
0x15ca   :  { %p1679_p4 = pnand %p1678_p3, %p1672_p0 }
0x1638   :  { %v969_v58 = vpop.permute.xlu1 %968 }
0x1639   :  { %v971_v59 = vadd.f32 %v1664_v54, %v969_v58 }
0x163b   :  { %973 = vrot.lane.b32.xlu0 %v971_v59, %s1695_s26 }
0x16ad   :  { %v974_v60 = vpop.permute.xlu0 %973 }
0x16ae   :  { %977 = vst.msk [vmem:[#allocation3 + $0x30] sm:$0xff] %vm52_vm0, %v974_v60  ;;  %1521 = vmatmul.mubr.msk.f32.vlgmr.msra.gmra.mrb[12].mxu1 %vm52_vm0, %v974_v60 }
0x16b5   :  { %v1094_v50 = vld [vmem:[#allocation3 + $0x30] sm:$0xff] }
0x1781   :  { %v1048_v61 = vpop.f32.mrb[12].mxu1 }
0x1782   :  { %v1059_v62 = vadd.f32 %v1048_v61, %v1848_v35  ;;  %v1522_v63 = vpop.f32.mrb[13].mxu1  ;;  %v1052_v1 = vadd.f32 %v1048_v61, %v979_v0 }
0x1784   :  { %1061 = vrot.lane.b32.xlu1 %v1059_v62, %s1695_s26  ;;  %v1341_v2 = vmul.f32 -1.442695, %v1052_v1 }
0x1786   :  { %1665 = vpow2.f32 %v1341_v2 }
0x1790   :  { %v1666_v3 = vpop.eup %1665 }
0x1791   :  { %v1056_v4 = vadd.f32 1.0, %v1666_v3 }
0x1793   :  { %1667 = vrcp.f32 %v1056_v4 }
0x179d   :  { %v1668_v5 = vpop.eup %1667 }
0x17f6   :  { %v1062_v6 = vpop.permute.xlu1 %1061 }
0x17f7   :  { %v1064_v7 = vmul.f32 %v1668_v5, %v1062_v6 }
0x17f9   :  { %1066 = vrot.lane.b32.xlu0 %v1064_v7, %s1695_s26 }
0x186b   :  { %v1067_v9 = vpop.permute.xlu0 %1066 }
0x186c   :  { %v1069_v35 = vadd.f32 %v1067_v9, %v979_v0 }
0x186e   :  { %1669 = vtanh.f32 %v1069_v35 }
0x1878   :  { %v1670_v10 = vpop.eup %1669 }
0x1879   :  { %v1071_v11 = vsub.f32 %v971_v59, %v1670_v10 }
0x187b   :  { %1073 = vrot.lane.b32.xlu1 %v1071_v11, %s1700_s19 }
0x187f   :  { %1106 = vperm.xlu1 %1621, %v1096_v12  }
0x1883   :  { %1116 = vperm.xlu1 %1621, %v1098_v15  }
0x1887   :  { %1121 = vperm.xlu1 %1621, %v1099_v16  }
0x188b   :  { %1131 = vperm.xlu1 %1621, %v1101_v17  }
0x188f   :  { %1136 = vperm.xlu1 %1621, %v1102_v18  }
0x18ed   :  { %v1074_v27 = vpop.permute.xlu1 %1073 }
0x18ee   :  { %v1076_v28 = vmul.f32 %v1668_v5, %v1074_v27 }
0x18f0   :  { %1078 = vrot.lane.b32.xlu0 %v1076_v28, %s1699_s5 }
0x18f4   :  { %1111 = vperm.xlu0 %1622, %v1097_v29  }
0x18f8   :  { %1126 = vperm.xlu0 %1622, %v1100_v30  }
0x18fe   :  { %v1107_v31 = vpop.permute.xlu1 %1106 }
0x18ff   :  { %v1144_v32 = vmul.f32 %v1107_v31, %v1088_v13 }
0x1901   :  { %1531 = vmatprep.mubr.msk.f32.mxu0 %vm52_vm0, %v1144_v32 }
0x1902   :  { %v1117_v33 = vpop.permute.xlu1 %1116 }
0x1903   :  { %v1146_v41 = vmul.f32 %v1117_v33, %v1090_v38 }
0x1906   :  { %v1122_v34 = vpop.permute.xlu1 %1121 }
0x1907   :  { %v1147_v45 = vmul.f32 %v1122_v34, %v1091_v42 }
0x190a   :  { %v1132_v39 = vpop.permute.xlu1 %1131 }
0x190b   :  { %v1149_v49 = vmul.f32 %v1132_v39, %v1093_v48 }
0x190e   :  { %v1137_v47 = vpop.permute.xlu1 %1136 }
0x190f   :  { %v1150_v51 = vmul.f32 %v1137_v47, %v1094_v50 }
0x1962   :  { %v1079_v20 = vpop.permute.xlu0 %1078 }
0x1963   :  { %v1081_v14 = vadd.f32 %v1670_v10, %v1079_v20 }
0x1965   :  { %1083 = vrot.lane.b32.xlu0 %v1081_v14, %s1695_s26 }
0x1969   :  { %1141 = vperm.xlu0 %1622, %v1103_v19  }
0x1973   :  { %v1112_v37 = vpop.permute.xlu0 %1111 }
0x1974   :  { %v1145_v40 = vmul.f32 %v1112_v37, %v1089_v36 }
0x1976   :  { %1532 = vmatmul.mubr.msk.f32.vlgmr.msra.gmra.mrb[10].mxu0 %vm52_vm0, %v1145_v40 }
0x1977   :  { %v1127_v44 = vpop.permute.xlu0 %1126  ;;  %1534 = vmatprep.mubr.msk.f32.mxu0 %vm52_vm0, %v1146_v41 }
0x1978   :  { %v1148_v46 = vmul.f32 %v1127_v44, %v1092_v43 }
0x197a   :  { %1535 = vmatmul.mubr.msk.f32.gmra.mrb[12].mxu0 %vm52_vm0, %v1147_v45 }
0x197b   :  { %1537 = vmatprep.mubr.msk.f32.mxu0 %vm52_vm0, %v1148_v46 }
0x197e   :  { %1538 = vmatmul.mubr.msk.f32.gmra.mrb[14].mxu0 %vm52_vm0, %v1149_v49 }
0x197f   :  { %1540 = vmatprep.mubr.msk.f32.mxu0 %vm52_vm0, %v1150_v51 }
0x19d7   :  { %v1084_v52 = vpop.permute.xlu0 %1083 }
0x19d8   :  { %1087 = vst.msk [vmem:[#allocation3 + $0x38] sm:$0xff] %vm52_vm0, %v1084_v52 }
0x19df   :  { %v1095_v53 = vld [vmem:[#allocation3 + $0x38] sm:$0xff] }
0x19e8   :  { %v1142_v54 = vpop.permute.xlu0 %1141 }
0x19e9   :  { %v1151_v55 = vmul.f32 %v1142_v54, %v1095_v53 }
0x19eb   :  { %1541 = vmatmul.mubr.msk.f32.gmra.mrb[16].mxu0 %vm52_vm0, %v1151_v55 }
0x1a49   :  { %v1533_v57 = vpop.f32.mrb[10].mxu0 }
0x1a4a   :  { %v1259_v58 = vadd.f32 %v1533_v57, %v1342_v56  ;;  %v1253_v59 = vpop.f32.mrb[11].mxu0 }
0x1a4b   :  { %v1254_v60 = vadd.f32 %v1342_v56, %v1253_v59 }
0x1a4c   :  { %1293 = vst [vmem:[#allocation4 + $0x8] sm:$0xff] %v1259_v58 }
0x1a4d   :  { %1292 = vst [vmem:[#allocation4] sm:$0xff] %v1254_v60  ;;  %v1536_v61 = vpop.f32.mrb[12].mxu0 }
0x1a4e   :  { %v1269_v62 = vadd.f32 %v1536_v61, %v1342_v56  ;;  %v1263_v63 = vpop.f32.mrb[13].mxu0 }
0x1a4f   :  { %v1264_v0 = vadd.f32 %v1342_v56, %v1263_v63 }
0x1a50   :  { %1295 = vst [vmem:[#allocation4 + $0x18] sm:$0xff] %v1269_v62 }
0x1a51   :  { %1294 = vst [vmem:[#allocation4 + $0x10] sm:$0xff] %v1264_v0  ;;  %v1539_v1 = vpop.f32.mrb[14].mxu0 }
0x1a52   :  { %v1279_v2 = vadd.f32 %v1539_v1, %v1342_v56  ;;  %v1273_v3 = vpop.f32.mrb[15].mxu0 }
0x1a53   :  { %v1274_v4 = vadd.f32 %v1342_v56, %v1273_v3 }
0x1a54   :  { %1297 = vst [vmem:[#allocation4 + $0x28] sm:$0xff] %v1279_v2 }
0x1a55   :  { %1296 = vst [vmem:[#allocation4 + $0x20] sm:$0xff] %v1274_v4 }
0x1abe   :  { %v1542_v5 = vpop.f32.mrb[16].mxu0 }
0x1abf   :  { %v1289_v6 = vadd.f32 %v1542_v5, %v1342_v56  ;;  %v1283_v7 = vpop.f32.mrb[17].mxu0 }
0x1ac0   :  { %v1284_v8 = vadd.f32 %v1342_v56, %v1283_v7 }
0x1ac1   :  { %1299 = vst [vmem:[#allocation4 + $0x38] sm:$0xff] %v1289_v6 }
0x1ac2   :  { %1298 = vst [vmem:[#allocation4 + $0x30] sm:$0xff] %v1284_v8 }
0x1ac3   :  { %1682 = shalt.err (!%p1679_p4)
}
0x1ac4   :  { %s1683_s23 = scalar_lea.hbm %s2026_s9, 1024 }
0x1ac5   :  { %p1684_p5 = scmp.ne.s32.totalorder %s2026_s9, %s1683_s23  ;;  %p1687_p6 = scmp.lt.u32.totalorder %s1683_s23, %s2026_s9 }
0x1ac7   :  { %p1689_p7 = pnand %p1687_p6, %p1684_p5 }
0x1ac9   :  { %1692 = shalt.err (!%p1689_p7)
}
0x1aca   :  { %s1703_s29 = smov 128   ;;  %s1704_s30 = smov 8  }
0x1acb   :  { %1311 = dma.vmem_to_hbm [thread:$0]  %s1306_s8, 1024, %s2026_s9, [#allocation5], %s1703_s29, %s1703_s29, %s1704_s30  }
0x1acc   :  { %1693 = dma.done.wait [#allocation5], 1024  }
0x1acd   :  { %1694 = vsyncadd [#allocation5], 4294966272 }
0x1ace   :  { %1315 = vsyncpa [#allocation5], 1 }

</bundles_post_ra>
